<compile_context>
chip_gen: v7x
topology: tpu7x:2x2x1
jax: 0.10.0
libtpu: 0.0.40
codegen_flags: <defaults>
</compile_context>

<pallas_src>
import functools

import jax
import jax.numpy as jnp
from jax.experimental import pallas as pl
from jax.experimental.pallas import tpu as pltpu


def _round_up(n, m):
    return ((n + m - 1) // m) * m


def _qnet_kernel(x_ref, w1_ref, b1_ref, w2_ref, b2_ref, w3_ref, b3_ref, o_ref):
    """Fused 3-layer MLP on one (TB, in_dim) batch tile.

    Dots run in bf16 on the MXU with f32 accumulation; bias/ReLU epilogue in f32.
    """
    x = x_ref[...].astype(jnp.bfloat16)  # (TB, in_dim) f32 -> bf16 (cheap VPU cast)

    h1 = jnp.dot(x, w1_ref[...], preferred_element_type=jnp.float32) + b1_ref[...]
    h1 = jnp.maximum(h1, 0.0).astype(jnp.bfloat16)

    h2 = jnp.dot(h1, w2_ref[...], preferred_element_type=jnp.float32) + b2_ref[...]
    h2 = jnp.maximum(h2, 0.0).astype(jnp.bfloat16)

    out = jnp.dot(h2, w3_ref[...], preferred_element_type=jnp.float32) + b3_ref[...]
    o_ref[...] = out.astype(o_ref.dtype)  # (TB, out_pad) lane-dense store


@functools.partial(jax.jit, static_argnames=("block_batch",))
def qnet_forward(x, w1, b1, w2, b2, w3, b3, *, block_batch=512):
    """Fused Q_net forward pass.

    Shapes:
      x : (B, input_dim)  float32
      w1: (input_dim, 128), b1: (1, 128)
      w2: (128, 128),       b2: (1, 128)
      w3: (128, output_dim), b3: (1, output_dim)
    Returns (B, output_dim) float32.
    """
    B, in_dim = x.shape
    hidden = w1.shape[1]
    out_dim = w3.shape[1]

    # --- lane-dense output: pad last layer to a multiple of 128 columns -------
    out_pad = _round_up(out_dim, 128)
    w3p = jnp.zeros((hidden, out_pad), w3.dtype).at[:, :out_dim].set(w3)
    b3p = jnp.zeros((1, out_pad), b3.dtype).at[:, :out_dim].set(b3)

    # --- batch tiling (sublane-aligned; pad batch to a tile multiple) ---------
    tb = min(block_batch, _round_up(B, 8))
    b_pad = _round_up(B, tb)
    if b_pad != B:
        x = jnp.pad(x, ((0, b_pad - B), (0, 0)))
    grid = (b_pad // tb,)

    # --- weights in bf16 (VMEM-resident, half-size); biases stay f32 ----------
    w1b = w1.astype(jnp.bfloat16)
    w2b = w2.astype(jnp.bfloat16)
    w3b = w3p.astype(jnp.bfloat16)
    b1f = b1.astype(jnp.float32)
    b2f = b2.astype(jnp.float32)
    b3f = b3p.astype(jnp.float32)
    xf = x.astype(jnp.float32)

    flops = 2 * b_pad * (in_dim * hidden + hidden * hidden + hidden * out_pad)
    bytes_accessed = (
        xf.size * 4
        + (w1b.size + w2b.size + w3b.size) * 2
        + (b1f.size + b2f.size + b3f.size) * 4
        + b_pad * out_pad * 4
    )

    out_padded = pl.pallas_call(
        _qnet_kernel,
        out_shape=jax.ShapeDtypeStruct((b_pad, out_pad), jnp.float32),
        grid=grid,
        in_specs=[
            pl.BlockSpec((tb, in_dim), lambda i: (i, 0)),        # x tile (pipelined)
            pl.BlockSpec((in_dim, hidden), lambda i: (0, 0)),    # W1 (resident)
            pl.BlockSpec((1, hidden), lambda i: (0, 0)),         # b1 (resident)
            pl.BlockSpec((hidden, hidden), lambda i: (0, 0)),    # W2 (resident)
            pl.BlockSpec((1, hidden), lambda i: (0, 0)),         # b2 (resident)
            pl.BlockSpec((hidden, out_pad), lambda i: (0, 0)),   # W3 (resident, padded)
            pl.BlockSpec((1, out_pad), lambda i: (0, 0)),        # b3 (resident, padded)
        ],
        out_specs=pl.BlockSpec((tb, out_pad), lambda i: (i, 0)),
        compiler_params=pltpu.CompilerParams(
            dimension_semantics=("parallel",),
        ),
        cost_estimate=pl.CostEstimate(
            flops=flops, transcendentals=0, bytes_accessed=bytes_accessed
        ),
    )(xf, w1b, b1f, w2b, b2f, w3b, b3f)

    # Slice away batch padding and the zero-padded output columns.
    return out_padded[:B, :out_dim]


def init_qnet_params(key, input_dim, output_dim, hidden=128):
    """Deterministic init mimicking PyTorch's default Linear init
    (uniform(-1/sqrt(fan_in), 1/sqrt(fan_in))). Weights stored (in, out)."""

    def linear(key, fan_in, fan_out):
        kw, kb = jax.random.split(key)
        bound = 1.0 / jnp.sqrt(fan_in)
        w = jax.random.uniform(kw, (fan_in, fan_out), jnp.float32, -bound, bound)
        b = jax.random.uniform(kb, (1, fan_out), jnp.float32, -bound, bound)
        return w, b

    k1, k2, k3 = jax.random.split(key, 3)
    w1, b1 = linear(k1, input_dim, hidden)
    w2, b2 = linear(k2, hidden, hidden)
    w3, b3 = linear(k3, hidden, output_dim)
    return w1, b1, w2, b2, w3, b3


def qnet_ref(x, w1, b1, w2, b2, w3, b3):
    """Pure-JAX f32 reference for correctness checking."""
    h1 = jnp.maximum(x @ w1 + b1, 0.0)
    h2 = jnp.maximum(h1 @ w2 + b2, 0.0)
    return h2 @ w3 + b3


if __name__ == "__main__":
    key = jax.random.PRNGKey(0)
    k_params, k_x = jax.random.split(key)

    # Small DQN-flavoured shapes (CartPole-like). batch=10 with block_batch=8
    # exercises the multi-step grid and the batch-padding / output-slicing path.
    batch, input_dim, output_dim = 10, 4, 2

    params = init_qnet_params(k_params, input_dim, output_dim)
    x = jax.random.normal(k_x, (batch, input_dim), jnp.float32)

    out = qnet_forward(x, *params, block_batch=8)
    out = jax.block_until_ready(out)

    ref = qnet_ref(x, *params)
    assert out.shape == (batch, output_dim)
    # bf16 MXU inputs with f32 accumulation -> compare with a bf16-appropriate tolerance.
    assert jnp.allclose(out, ref, atol=3e-2, rtol=3e-2), float(
        jnp.max(jnp.abs(out - ref))
    )

    print("KERNEL_OK")
</pallas_src>

<mosaic_0001>
module attributes {stable_mosaic.version = 11 : i64} {
  func.func @_qnet_kernel(%arg0: i32, %arg1: memref<8x4xf32, #tpu.memory_space<vmem>>, %arg2: memref<4x128xbf16, #tpu.memory_space<vmem>>, %arg3: memref<1x128xf32, #tpu.memory_space<vmem>>, %arg4: memref<128x128xbf16, #tpu.memory_space<vmem>>, %arg5: memref<1x128xf32, #tpu.memory_space<vmem>>, %arg6: memref<128x128xbf16, #tpu.memory_space<vmem>>, %arg7: memref<1x128xf32, #tpu.memory_space<vmem>>, %arg8: memref<8x128xf32, #tpu.memory_space<vmem>>) attributes {dimension_semantics = [#tpu.dimension_semantics<parallel>], iteration_bounds = array<i64: 2>, scalar_prefetch = 0 : i64, scratch_operands = 0 : i64, tpu.core_type = #tpu.core_type<tc>, window_params = [{transform_indices = @transform_0, window_bounds = array<i64: 8, 4>}, {pipeline_mode = #tpu.pipeline_mode<synchronous>, transform_indices = @transform_1, window_bounds = array<i64: 4, 128>}, {pipeline_mode = #tpu.pipeline_mode<synchronous>, transform_indices = @transform_2, window_bounds = array<i64: 1, 128>}, {pipeline_mode = #tpu.pipeline_mode<synchronous>, transform_indices = @transform_3, window_bounds = array<i64: 128, 128>}, {pipeline_mode = #tpu.pipeline_mode<synchronous>, transform_indices = @transform_4, window_bounds = array<i64: 1, 128>}, {pipeline_mode = #tpu.pipeline_mode<synchronous>, transform_indices = @transform_5, window_bounds = array<i64: 128, 128>}, {pipeline_mode = #tpu.pipeline_mode<synchronous>, transform_indices = @transform_6, window_bounds = array<i64: 1, 128>}, {transform_indices = @transform_7, window_bounds = array<i64: 8, 128>}]} {
    %c0 = arith.constant 0 : index
    %c0_0 = arith.constant 0 : index
    %0 = vector.load %arg1[%c0, %c0_0] : memref<8x4xf32, #tpu.memory_space<vmem>>, vector<8x4xf32>
    %1 = arith.truncf %0 : vector<8x4xf32> to vector<8x4xbf16>
    %c0_1 = arith.constant 0 : index
    %c0_2 = arith.constant 0 : index
    %2 = vector.load %arg2[%c0_1, %c0_2] : memref<4x128xbf16, #tpu.memory_space<vmem>>, vector<4x128xbf16>
    %cst = arith.constant dense<0.000000e+00> : vector<8x128xf32>
    %3 = tpu.matmul %1, %2, %cst {dimension_numbers = #tpu.dot_dimension_numbers<[1], [0], [0], [1], [0, 0, 1, 1], [], []>} : vector<8x4xbf16>, vector<4x128xbf16>, vector<8x128xf32> -> vector<8x128xf32>
    %c0_3 = arith.constant 0 : index
    %c0_4 = arith.constant 0 : index
    %4 = vector.load %arg3[%c0_3, %c0_4] : memref<1x128xf32, #tpu.memory_space<vmem>>, vector<1x128xf32>
    %5 = vector.broadcast %4 : vector<1x128xf32> to vector<8x128xf32>
    %6 = arith.addf %3, %5 : vector<8x128xf32>
    %cst_5 = arith.constant 0.000000e+00 : f32
    %7 = vector.broadcast %cst_5 : f32 to vector<8x128xf32>
    %8 = arith.maximumf %6, %7 : vector<8x128xf32>
    %9 = arith.truncf %8 : vector<8x128xf32> to vector<8x128xbf16>
    %c0_6 = arith.constant 0 : index
    %c0_7 = arith.constant 0 : index
    %10 = vector.load %arg4[%c0_6, %c0_7] : memref<128x128xbf16, #tpu.memory_space<vmem>>, vector<128x128xbf16>
    %cst_8 = arith.constant dense<0.000000e+00> : vector<8x128xf32>
    %11 = tpu.matmul %9, %10, %cst_8 {dimension_numbers = #tpu.dot_dimension_numbers<[1], [0], [0], [1], [0, 0, 1, 1], [], []>} : vector<8x128xbf16>, vector<128x128xbf16>, vector<8x128xf32> -> vector<8x128xf32>
    %c0_9 = arith.constant 0 : index
    %c0_10 = arith.constant 0 : index
    %12 = vector.load %arg5[%c0_9, %c0_10] : memref<1x128xf32, #tpu.memory_space<vmem>>, vector<1x128xf32>
    %13 = vector.broadcast %12 : vector<1x128xf32> to vector<8x128xf32>
    %14 = arith.addf %11, %13 : vector<8x128xf32>
    %cst_11 = arith.constant 0.000000e+00 : f32
    %15 = vector.broadcast %cst_11 : f32 to vector<8x128xf32>
    %16 = arith.maximumf %14, %15 : vector<8x128xf32>
    %17 = arith.truncf %16 : vector<8x128xf32> to vector<8x128xbf16>
    %c0_12 = arith.constant 0 : index
    %c0_13 = arith.constant 0 : index
    %18 = vector.load %arg6[%c0_12, %c0_13] : memref<128x128xbf16, #tpu.memory_space<vmem>>, vector<128x128xbf16>
    %cst_14 = arith.constant dense<0.000000e+00> : vector<8x128xf32>
    %19 = tpu.matmul %17, %18, %cst_14 {dimension_numbers = #tpu.dot_dimension_numbers<[1], [0], [0], [1], [0, 0, 1, 1], [], []>} : vector<8x128xbf16>, vector<128x128xbf16>, vector<8x128xf32> -> vector<8x128xf32>
    %c0_15 = arith.constant 0 : index
    %c0_16 = arith.constant 0 : index
    %20 = vector.load %arg7[%c0_15, %c0_16] : memref<1x128xf32, #tpu.memory_space<vmem>>, vector<1x128xf32>
    %21 = vector.broadcast %20 : vector<1x128xf32> to vector<8x128xf32>
    %22 = arith.addf %19, %21 : vector<8x128xf32>
    %c0_17 = arith.constant 0 : index
    %c0_18 = arith.constant 0 : index
    %23 = vector.load %arg8[%c0_17, %c0_18] : memref<8x128xf32, #tpu.memory_space<vmem>>, vector<8x128xf32>
    tpu.vector_store %arg8[%c0_17, %c0_18], %22 {strides = array<i32>} : memref<8x128xf32, #tpu.memory_space<vmem>>, vector<8x128xf32>,
    return
  }
  func.func @transform_0(%arg0: i32) -> (i32, i32) {
    %c0_i32 = arith.constant 0 : i32
    %c0_i32_0 = arith.constant 0 : i32
    return %arg0, %c0_i32 : i32, i32
  }
  func.func @transform_1(%arg0: i32) -> (i32, i32) {
    %c0_i32 = arith.constant 0 : i32
    %c0_i32_0 = arith.constant 0 : i32
    %c0_i32_1 = arith.constant 0 : i32
    return %c0_i32, %c0_i32_0 : i32, i32
  }
  func.func @transform_2(%arg0: i32) -> (i32, i32) {
    %c0_i32 = arith.constant 0 : i32
    %c0_i32_0 = arith.constant 0 : i32
    %c0_i32_1 = arith.constant 0 : i32
    return %c0_i32, %c0_i32_0 : i32, i32
  }
  func.func @transform_3(%arg0: i32) -> (i32, i32) {
    %c0_i32 = arith.constant 0 : i32
    %c0_i32_0 = arith.constant 0 : i32
    %c0_i32_1 = arith.constant 0 : i32
    return %c0_i32, %c0_i32_0 : i32, i32
  }
  func.func @transform_4(%arg0: i32) -> (i32, i32) {
    %c0_i32 = arith.constant 0 : i32
    %c0_i32_0 = arith.constant 0 : i32
    %c0_i32_1 = arith.constant 0 : i32
    return %c0_i32, %c0_i32_0 : i32, i32
  }
  func.func @transform_5(%arg0: i32) -> (i32, i32) {
    %c0_i32 = arith.constant 0 : i32
    %c0_i32_0 = arith.constant 0 : i32
    %c0_i32_1 = arith.constant 0 : i32
    return %c0_i32, %c0_i32_0 : i32, i32
  }
  func.func @transform_6(%arg0: i32) -> (i32, i32) {
    %c0_i32 = arith.constant 0 : i32
    %c0_i32_0 = arith.constant 0 : i32
    %c0_i32_1 = arith.constant 0 : i32
    return %c0_i32, %c0_i32_0 : i32, i32
  }
  func.func @transform_7(%arg0: i32) -> (i32, i32) {
    %c0_i32 = arith.constant 0 : i32
    %c0_i32_0 = arith.constant 0 : i32
    return %arg0, %c0_i32 : i32, i32
  }
}

</mosaic_0001>

<bundles_post_ra>
// kernel: qnet_forward.1
= control target key start
LH: loop header
LB: loop body
LE: loop exit
PB: predicated region body
PF: predicated region fallthrough
CT: control target
= control target key end

     0   :  { %s784_s24 = smov 0   ;;  %s891_s0 = inlined_call_operand.vmem [shape: f32[16,4], index: 0, kind: input, shape index: {}]   ;;  %s892_s1 = inlined_call_operand.vmem [shape: bf16[4,128], index: 1, kind: input, shape index: {}]   ;;  %s893_s2 = inlined_call_operand.vmem [shape: f32[1,128], index: 2, kind: input, shape index: {}]   ;;  %s894_s3 = inlined_call_operand.vmem [shape: bf16[128,128], index: 3, kind: input, shape index: {}]   ;;  %s895_s4 = inlined_call_operand.vmem [shape: f32[1,128], index: 4, kind: input, shape index: {}]   ;;  %s896_s5 = inlined_call_operand.vmem [shape: bf16[128,128], index: 5, kind: input, shape index: {}]   ;;  %s897_s6 = inlined_call_operand.vmem [shape: f32[1,128], index: 6, kind: input, shape index: {}]   ;;  %s898_s7 = inlined_call_operand.vmem [shape: f32[16,128], index: 7, kind: output, shape index: {}]  }
   0x1 LB: > { %s613_s25 = sadd.s32 4294967295, %s740_s24   ;;  %p617_p0 = scmp.ge.s32.totalorder %s740_s24, 1  ;;  %s740_s24 = sphi %s784_s24, %s17_s24  }
   0x2   : > { %p236_p1 = scmp.lt.s32.totalorder %s740_s24, 3 }
   0x4   : > { %p237_p2 = pnand %p617_p0, %p236_p1 }
   0x5   : > { %v277_v0 = vld [vmem:[%s892_s1] sm:$0x3] (!%p237_p2)  ;;  %vm289_vm0 = vcmask (!%p237_p2), 1041408   ;;  %p266_p3 = scmp.lt.s32.totalorder (!%p237_p2), %s613_s25, 1  ;;  %v742_v1 = vmov (!%p237_p2), 0.0   ;;  %vm743_vm1 = vmmov (!%p237_p2), 0  }
   0x6   : > { %240 = sbr.rel (%p237_p2) target bundleno = 670 (0x29e), region = 48  ;;  %662 = vmatprep.subr.bf16.mxu0 (!%p237_p2), %v742_v1  ;;  %v291_v2 = vsel (!%p237_p2), %vm289_vm0, %v277_v0, 0  ;;  %664 = vmatprep.mubr.msk.bf16.mxu0 (!%p237_p2), %vm743_vm1, %v742_v1  ;;  %v718_v3 = vld [vmem:[%s894_s3] sm:$0xff] (!%p237_p2)   ;;  %v719_v4 = vld [vmem:[%s894_s3 + $0x8] sm:$0xff] (!%p237_p2)   ;;  %vm285_vm2 = vcmask (!%p237_p2), 31744   ;;  %v720_v7 = vld [vmem:[%s894_s3 + $0x10] sm:$0xff] (!%p237_p2)  }
   0x7   : > { %663 = vmatpush3.bf16.msra.mxu0 (!%p237_p2), %v291_v2  ;;  %668 = vmatprep.subr.bf16.mxu1 (!%p237_p2), %v742_v1  ;;  %v721_v8 = vld [vmem:[%s894_s3 + $0x18] sm:$0xff] (!%p237_p2)   ;;  %v722_v9 = vld [vmem:[%s894_s3 + $0x20] sm:$0xff] (!%p237_p2)   ;;  %v723_v10 = vld [vmem:[%s894_s3 + $0x28] sm:$0xff] (!%p237_p2)  }
   0x8   : > { %684 = vmatprep.mubr.msk.bf16.mxu1 (!%p237_p2), %vm743_vm1, %v742_v1  ;;  %688 = vmatprep.subr.bf16.mxu0 (!%p237_p2), %v742_v1  ;;  %v724_v11 = vld [vmem:[%s894_s3 + $0x30] sm:$0xff] (!%p237_p2)   ;;  %v725_v12 = vld [vmem:[%s894_s3 + $0x38] sm:$0xff] (!%p237_p2)   ;;  %v726_v13 = vld [vmem:[%s896_s5] sm:$0xff] (!%p237_p2)  }
   0x9   : > { %669 = vmatpush3.bf16.msra.mxu1 (!%p237_p2), %v718_v3  ;;  %v727_v14 = vld [vmem:[%s896_s5 + $0x8] sm:$0xff] (!%p237_p2)   ;;  %v728_v15 = vld [vmem:[%s896_s5 + $0x10] sm:$0xff] (!%p237_p2)   ;;  %v729_v16 = vld [vmem:[%s896_s5 + $0x18] sm:$0xff] (!%p237_p2)  }
   0xa   : > { %670 = vmatprep.subr.bf16.mxu1 (!%p237_p2), %v742_v1  ;;  %v730_v17 = vld [vmem:[%s896_s5 + $0x20] sm:$0xff] (!%p237_p2)   ;;  %v731_v18 = vld [vmem:[%s896_s5 + $0x28] sm:$0xff] (!%p237_p2)   ;;  %v732_v27 = vld [vmem:[%s896_s5 + $0x30] sm:$0xff] (!%p237_p2)  }
   0xb   : > { %v620_v19 = vld [vmem:[%s893_s2] ss:$0 sm:$0xff] (!%p237_p2)  ;;  %v733_v28 = vld [vmem:[%s896_s5 + $0x38] sm:$0xff] (!%p237_p2)  }
   0xc   : > { %v622_v29 = vld [vmem:[%s895_s4] ss:$0 sm:$0xff] (!%p237_p2) }
   0xd   : > { %s900_s25 = smov (!%p266_p3, %s613_s25), 1  ;;  %671 = vmatpush3.bf16.msra.mxu1 %v719_v4  ;;  %v631_v37 = vld [vmem:[%s897_s6] ss:$0 sm:$0xff] }
   0xe   : > { %s618_s30 = sshll.u32 %s900_s25, 3  ;;  %672 = vmatprep.subr.bf16.mxu1 %v742_v1 }
   0xf   : > { %s269_s12 = scalar_lea.vmem %s891_s0, %s618_s30  ;;  %s273_s9 = scalar_lea.vmem %s898_s7, %s618_s30 }
  0x10   : > { %v275_v5 = vld [vmem:[%s269_s12] sm:$0xff] }
  0x11   : > { %v276_v6 = vpack.c.bf16 %v275_v5, %v275_v5  ;;  %673 = vmatpush3.bf16.msra.mxu1 %v720_v7 }
  0x12   : > { %674 = vmatprep.subr.bf16.mxu1 %v742_v1 }
  0x13   : > { %665 = vmatmul.mubr.msk.bf16.vlgmr.msra.gmra.mrb[0].mxu0 %vm285_vm2, %v276_v6 }
  0x14   : > { %704 = vmatprep.mubr.msk.bf16.mxu0 %vm743_vm1, %v742_v1  ;;  %689 = vmatpush3.bf16.msra.mxu0 %v726_v13 }
  0x15   : > { %675 = vmatpush3.bf16.msra.mxu1 %v721_v8  ;;  %690 = vmatprep.subr.bf16.mxu0 %v742_v1 }
  0x16   : > { %676 = vmatprep.subr.bf16.mxu1 %v742_v1 }
  0x18   : > { %691 = vmatpush3.bf16.msra.mxu0 %v727_v14 }
  0x19   : > { %677 = vmatpush3.bf16.msra.mxu1 %v722_v9  ;;  %692 = vmatprep.subr.bf16.mxu0 %v742_v1 }
  0x1a   : > { %678 = vmatprep.subr.bf16.mxu1 %v742_v1 }
  0x1c   : > { %693 = vmatpush3.bf16.msra.mxu0 %v728_v15 }
  0x1d   : > { %679 = vmatpush3.bf16.msra.mxu1 %v723_v10  ;;  %694 = vmatprep.subr.bf16.mxu0 %v742_v1 }
  0x1e   : > { %680 = vmatprep.subr.bf16.mxu1 %v742_v1 }
  0x20   : > { %695 = vmatpush3.bf16.msra.mxu0 %v729_v16 }
  0x21   : > { %681 = vmatpush3.bf16.msra.mxu1 %v724_v11  ;;  %696 = vmatprep.subr.bf16.mxu0 %v742_v1 }
  0x22   : > { %682 = vmatprep.subr.bf16.mxu1 %v742_v1 }
  0x24   : > { %697 = vmatpush3.bf16.msra.mxu0 %v730_v17 }
  0x25   : > { %683 = vmatpush3.bf16.msra.mxu1 %v725_v12  ;;  %698 = vmatprep.subr.bf16.mxu0 %v742_v1 }
  0x28   : > { %699 = vmatpush3.bf16.msra.mxu0 %v731_v18 }
  0x29   : > { %700 = vmatprep.subr.bf16.mxu0 %v742_v1 }
  0x2c   : > { %701 = vmatpush3.bf16.msra.mxu0 %v732_v27 }
  0x2d   : > { %702 = vmatprep.subr.bf16.mxu0 %v742_v1 }
  0x30   : > { %703 = vmatpush3.bf16.msra.mxu0 %v733_v28 }
  0xe6   : > { %v327_v20 = vpop.f32.mrb[0].mxu0 }
  0xe7   : > { %v328_v21 = vadd.f32 %v620_v19, %v327_v20  ;;  %v666_v22 = vpop.f32.mrb[1].mxu0 }
  0xe8   : > { %v330_v23 = vpop.f32.mrb[2].mxu0 }
  0xe9   : > { %v333_v24 = vmax.f32 %v328_v21, 0.0  ;;  %v667_v25 = vpop.f32.mrb[3].mxu0 }
  0xeb   : > { %v334_v26 = vpack.c.bf16 %v333_v24, %v333_v24 }
  0xed   : > { %685 = vmatmul.mubr.bf16.vlgmr.msra.gmra.mrb[0].mxu1 %v334_v26 }
 0x1c0   : > { %v440_v30 = vpop.f32.mrb[0].mxu1 }
 0x1c1   : > { %v441_v31 = vadd.f32 %v622_v29, %v440_v30  ;;  %v686_v32 = vpop.f32.mrb[1].mxu1 }
 0x1c2   : > { %v443_v33 = vpop.f32.mrb[2].mxu1 }
 0x1c3   : > { %v446_v34 = vmax.f32 %v441_v31, 0.0  ;;  %v687_v35 = vpop.f32.mrb[3].mxu1 }
 0x1c5   : > { %v447_v36 = vpack.c.bf16 %v446_v34, %v446_v34 }
 0x1c7   : > { %705 = vmatmul.mubr.bf16.vlgmr.msra.gmra.mrb[4].mxu0 %v447_v36 }
 0x29a   : > { %v553_v38 = vpop.f32.mrb[4].mxu0 }
 0x29b   : > { %v554_v39 = vadd.f32 %v631_v37, %v553_v38  ;;  %v706_v40 = vpop.f32.mrb[5].mxu0 }
 0x29c   : > { %v556_v41 = vpop.f32.mrb[6].mxu0 }
 0x29d   : > { %559 = vst [vmem:[%s273_s9] sm:$0xff] %v554_v39  ;;  %v707_v42 = vpop.f32.mrb[7].mxu0 }
 0x29e PF: > { %s17_s24 = sadd.s32 1, %s740_s24  }
 0x29f   : > { %p14_p4 = scmp.ge.s32.totalorder %s17_s24, 4  }
 0x2a1   :  { %16 = sbr.rel (!%p14_p4) target bundleno = 1 (0x1), region = 78 }

</bundles_post_ra>
